<compile_context>
chip_gen: v7x
topology: tpu7x:2x2x1
jax: 0.10.0
libtpu: 0.0.40
codegen_flags: <defaults>
</compile_context>

<pallas_src>
import numpy as np
import jax
import jax.numpy as jnp
from jax.experimental import pallas as pl
from jax.experimental.pallas import tpu as pltpu


def _interp_matrix(out_size, in_size, mode, align_corners):
    """Row-stochastic (out_size, in_size) interpolation matrix matching PyTorch."""
    m = np.zeros((out_size, in_size), np.float32)
    rows = np.arange(out_size)
    if mode == "nearest":
        # Legacy PyTorch 'nearest': src = floor(dst * in / out).
        # (Note: 'nearest-exact' in torch >= 1.11 uses a different formula.)
        idx = np.floor(rows * in_size / out_size).astype(np.int64)
        idx = np.clip(idx, 0, in_size - 1)
        m[rows, idx] = 1.0
    elif mode in ("linear", "bilinear", "trilinear"):
        if align_corners and out_size > 1:
            src = rows * (in_size - 1) / max(out_size - 1, 1)
        else:
            src = (rows + 0.5) * (in_size / out_size) - 0.5
            src = np.clip(src, 0.0, in_size - 1)
        lo = np.floor(src).astype(np.int64)
        hi = np.minimum(lo + 1, in_size - 1)
        w_hi = (src - lo).astype(np.float32)
        m[rows, lo] += 1.0 - w_hi
        m[rows, hi] += w_hi
    else:
        # TODO(synk): other interpolate modes (bicubic, area) not implemented.
        raise NotImplementedError(f"mode={mode}")
    return m


def _pick_batch(nc, h, w, h_out, w_out, itemsize, mat_itemsize,
                vmem_budget_bytes=12 * 1024 * 1024):
    """Pick how many (H, W) planes to process per grid step."""

    def valid(b):
        if nc % b:
            return False
        if b == nc:  # block spans the full first axis -> always legal
            return True
        # sublane dims of the 2-D input/output blocks must be multiples of 8
        return (b * h) % 8 == 0 and (b * h_out) % 8 == 0

    def vmem_est(b):
        blocks = 2 * b * (h * w + h_out * w_out) * itemsize           # dbl-buffered io
        matrices = 2 * (w * w_out + (b * h_out) * (b * h)) * mat_itemsize
        interm = b * h * w_out * 4                                    # f32 temp
        return blocks + matrices + interm

    cands = [b for b in range(1, nc + 1) if valid(b)]                 # b == nc always valid
    fitting = [b for b in cands if vmem_est(b) <= vmem_budget_bytes]
    pool = fitting if fitting else cands[:1]
    b = max(pool)
    # Keep >= 2 grid steps when possible so v7x can use both TensorCores.
    if nc // b < 2:
        smaller = [c for c in pool if nc // c >= 2]
        if smaller:
            b = max(smaller)
    return b


def _upsample_kernel(awt_ref, ahb_ref, x_ref, o_ref):
    # awt_ref: (W, W_out)        column-interp matrix, pre-transposed
    # ahb_ref: (B*H_out, B*H)    block-diagonal row-interp matrix  I_B (x) A_h
    # x_ref:   (B*H, W)          B stacked input planes
    # o_ref:   (B*H_out, W_out)  B stacked output planes
    t = jnp.dot(x_ref[...], awt_ref[...], preferred_element_type=jnp.float32)
    t = t.astype(ahb_ref.dtype)  # keep the bf16 path on the bf16 MXU
    y = jnp.dot(ahb_ref[...], t, preferred_element_type=jnp.float32)
    o_ref[...] = y.astype(o_ref.dtype)


def upsample_pallas(x, size=None, scale_factor=None, mode="nearest",
                    align_corners=False):
    """Equivalent of Upsample(size, scale_factor, mode, align_corners)(x), NCHW."""
    if x.ndim != 4:
        # TODO(synk): 5-D NCDHW (trilinear) inputs not supported by this kernel.
        raise NotImplementedError("upsample_pallas expects a 4-D NCHW input")
    N, C, H, W = x.shape
    if size is not None:
        H_out, W_out = (size, size) if isinstance(size, int) else tuple(size)
    else:
        sf = scale_factor if isinstance(scale_factor, (tuple, list)) else (scale_factor,) * 2
        H_out = int(np.floor(H * float(sf[0])))
        W_out = int(np.floor(W * float(sf[1])))

    mat_dtype = jnp.bfloat16 if x.dtype == jnp.bfloat16 else jnp.float32
    itemsize = np.dtype(x.dtype).itemsize
    mat_itemsize = np.dtype(mat_dtype).itemsize

    NC = N * C
    B = _pick_batch(NC, H, W, H_out, W_out, itemsize, mat_itemsize)

    ah = _interp_matrix(H_out, H, mode, align_corners)               # (H_out, H)
    aw = _interp_matrix(W_out, W, mode, align_corners)               # (W_out, W)
    # Block-diagonal expansion so the H-axis interpolation of B stacked planes
    # is a single 2-D matmul on the (B*H, W_out) intermediate.
    ahb = jnp.asarray(np.kron(np.eye(B, dtype=np.float32), ah), dtype=mat_dtype)
    awt = jnp.asarray(aw.T, dtype=mat_dtype)                         # (W, W_out)

    xf = x.reshape(NC * H, W)                                        # free reshape
    grid = (NC // B,)

    flops = 2 * NC * W_out * (H * W + B * H_out * H)   # MXU work (incl. block-diag zeros)
    bytes_accessed = (NC * (H * W + H_out * W_out)) * itemsize \
        + (W * W_out + (B * H_out) * (B * H)) * mat_itemsize

    out = pl.pallas_call(
        _upsample_kernel,
        out_shape=jax.ShapeDtypeStruct((NC * H_out, W_out), x.dtype),
        grid_spec=pltpu.PrefetchScalarGridSpec(
            num_scalar_prefetch=0,
            grid=grid,
            in_specs=[
                # constant matrices: block index never changes, so they are
                # only DMA'd once by the pipeline
                pl.BlockSpec((W, W_out), lambda i: (0, 0)),
                pl.BlockSpec((B * H_out, B * H), lambda i: (0, 0)),
                pl.BlockSpec((B * H, W), lambda i: (i, 0)),
            ],
            out_specs=pl.BlockSpec((B * H_out, W_out), lambda i: (i, 0)),
        ),
        compiler_params=pltpu.CompilerParams(
            dimension_semantics=("parallel",),
            vmem_limit_bytes=64 * 1024 * 1024,
        ),
        cost_estimate=pl.CostEstimate(
            flops=int(flops),
            transcendentals=0,
            bytes_accessed=int(bytes_accessed)),
    )(awt, ahb, xf)
    return out.reshape(N, C, H_out, W_out)


if __name__ == "__main__":
    key = jax.random.PRNGKey(0)
    x = jax.random.normal(key, (2, 4, 16, 16), dtype=jnp.float32)

    # Default module config: mode='nearest', scale_factor=2.
    y_nearest = jax.block_until_ready(
        upsample_pallas(x, scale_factor=2, mode="nearest"))
    assert y_nearest.shape == (2, 4, 32, 32)

    # Reference check for nearest (pure indexing).
    idx = np.clip(np.floor(np.arange(32) * 16 / 32).astype(np.int64), 0, 15)
    ref_nearest = np.asarray(x)[:, :, idx][:, :, :, idx]
    np.testing.assert_allclose(np.asarray(y_nearest), ref_nearest,
                               rtol=1e-6, atol=1e-6)

    # bf16 path (stays on the bf16 MXU; exact for nearest since weights are 0/1).
    x_bf16 = x.astype(jnp.bfloat16)
    y_bf16 = jax.block_until_ready(
        upsample_pallas(x_bf16, scale_factor=2, mode="nearest"))
    ref_bf16 = np.asarray(x_bf16).astype(np.float32)[:, :, idx][:, :, :, idx]
    np.testing.assert_array_equal(np.asarray(y_bf16).astype(np.float32), ref_bf16)

    # Bilinear path (nnUNet upsample_mode='bilinear'), checked against the
    # dense A_h X A_w^T reference.
    y_bilinear = jax.block_until_ready(
        upsample_pallas(x, scale_factor=2, mode="bilinear", align_corners=False))
    ah_ref = _interp_matrix(32, 16, "bilinear", False)
    aw_ref = _interp_matrix(32, 16, "bilinear", False)
    ref_bilinear = np.einsum("oh,nchw,vw->ncov", ah_ref, np.asarray(x), aw_ref)
    np.testing.assert_allclose(np.asarray(y_bilinear), ref_bilinear,
                               rtol=1e-5, atol=1e-5)

    print("KERNEL_OK")
</pallas_src>

<mosaic_0001>
module attributes {stable_mosaic.version = 11 : i64} {
  func.func @_upsample_kernel(%arg0: i32, %arg1: memref<16x32xf32, #tpu.memory_space<vmem>>, %arg2: memref<128x64xf32, #tpu.memory_space<vmem>>, %arg3: memref<64x16xf32, #tpu.memory_space<vmem>>, %arg4: memref<128x32xf32, #tpu.memory_space<vmem>>) attributes {dimension_semantics = [#tpu.dimension_semantics<parallel>], iteration_bounds = array<i64: 2>, scalar_prefetch = 0 : i64, scratch_operands = 0 : i64, tpu.core_type = #tpu.core_type<tc>, window_params = [{pipeline_mode = #tpu.pipeline_mode<synchronous>, transform_indices = @transform_0, window_bounds = array<i64: 16, 32>}, {pipeline_mode = #tpu.pipeline_mode<synchronous>, transform_indices = @transform_1, window_bounds = array<i64: 128, 64>}, {transform_indices = @transform_2, window_bounds = array<i64: 64, 16>}, {transform_indices = @transform_3, window_bounds = array<i64: 128, 32>}]} {
    %c0 = arith.constant 0 : index
    %c0_0 = arith.constant 0 : index
    %0 = vector.load %arg3[%c0, %c0_0] : memref<64x16xf32, #tpu.memory_space<vmem>>, vector<64x16xf32>
    %c0_1 = arith.constant 0 : index
    %c0_2 = arith.constant 0 : index
    %1 = vector.load %arg1[%c0_1, %c0_2] : memref<16x32xf32, #tpu.memory_space<vmem>>, vector<16x32xf32>
    %cst = arith.constant dense<0.000000e+00> : vector<64x32xf32>
    %2 = tpu.matmul %0, %1, %cst {dimension_numbers = #tpu.dot_dimension_numbers<[1], [0], [0], [1], [0, 0, 1, 1], [], []>} : vector<64x16xf32>, vector<16x32xf32>, vector<64x32xf32> -> vector<64x32xf32>
    %c0_3 = arith.constant 0 : index
    %c0_4 = arith.constant 0 : index
    %3 = vector.load %arg2[%c0_3, %c0_4] : memref<128x64xf32, #tpu.memory_space<vmem>>, vector<128x64xf32>
    %cst_5 = arith.constant dense<0.000000e+00> : vector<128x32xf32>
    %4 = tpu.matmul %3, %2, %cst_5 {dimension_numbers = #tpu.dot_dimension_numbers<[1], [0], [0], [1], [0, 0, 1, 1], [], []>} : vector<128x64xf32>, vector<64x32xf32>, vector<128x32xf32> -> vector<128x32xf32>
    %c0_6 = arith.constant 0 : index
    %c0_7 = arith.constant 0 : index
    %5 = vector.load %arg4[%c0_6, %c0_7] : memref<128x32xf32, #tpu.memory_space<vmem>>, vector<128x32xf32>
    tpu.vector_store %arg4[%c0_6, %c0_7], %4 {strides = array<i32>} : memref<128x32xf32, #tpu.memory_space<vmem>>, vector<128x32xf32>,
    return
  }
  func.func @transform_0(%arg0: i32) -> (i32, i32) {
    %c0_i32 = arith.constant 0 : i32
    %c0_i32_0 = arith.constant 0 : i32
    %c0_i32_1 = arith.constant 0 : i32
    return %c0_i32, %c0_i32_0 : i32, i32
  }
  func.func @transform_1(%arg0: i32) -> (i32, i32) {
    %c0_i32 = arith.constant 0 : i32
    %c0_i32_0 = arith.constant 0 : i32
    %c0_i32_1 = arith.constant 0 : i32
    return %c0_i32, %c0_i32_0 : i32, i32
  }
  func.func @transform_2(%arg0: i32) -> (i32, i32) {
    %c0_i32 = arith.constant 0 : i32
    %c0_i32_0 = arith.constant 0 : i32
    return %arg0, %c0_i32 : i32, i32
  }
  func.func @transform_3(%arg0: i32) -> (i32, i32) {
    %c0_i32 = arith.constant 0 : i32
    %c0_i32_0 = arith.constant 0 : i32
    return %arg0, %c0_i32 : i32, i32
  }
}

</mosaic_0001>

<bundles_post_ra>
// kernel: tpu_custom_call.1
= control target key start
LH: loop header
LB: loop body
LE: loop exit
PB: predicated region body
PF: predicated region fallthrough
CT: control target
= control target key end

     0   :  { %8 = vsyncpa [#allocation3], 0  ;;  %s1414_s0 = inlined_call_operand.hbm [shape: f32[16,32], index: 0, kind: input, shape index: {}]   ;;  %s1415_s1 = inlined_call_operand.hbm [shape: f32[128,64], index: 1, kind: input, shape index: {}]   ;;  %s1416_s2 = inlined_call_operand.hbm [shape: f32[128,16], index: 2, kind: input, shape index: {}]   ;;  %s1417_s3 = inlined_call_operand.hbm [shape: f32[256,32], index: 3, kind: output, shape index: {}]  }
   0x1   :  { %9 = vsyncpa [#allocation6], 0 }
   0x2   :  { %10 = vsyncpa [#allocation4], 0 }
   0x3   :  { %12 = vsyncpa [#allocation4 + $0x1], 0  ;;  %s1114_s12 = smov 0   ;;  %s1116_s13 = smov 0  }
   0x4   :  { %s1118_s14 = smov 0   ;;  %s1120_s15 = smov 0  }
   0x5 LB: > { %s1135_s16 = sadd.s32 4294967295, %s1084_s15   ;;  %s691_s17 = sadd.s32 4294967294, %s1084_s15   ;;  %s1084_s15 = sphi %s1120_s15, %s1445_s15   ;;  %s1080_s14 = sphi %s1118_s14, %s1444_s14   ;;  %s1076_s13 = sphi %s1116_s13, %s1443_s13   ;;  %s1072_s12 = sphi %s1114_s12, %s1442_s12  }
   0x6   : > { %s1139_s18 = sadd.s32 1, %s1084_s15   ;;  %s67_s19 = sadd.s32 1, %s1080_s14 }
   0x7   : > { %s64_s20 = ssub.s32 %s1084_s15, %s1139_s18  ;;  %p74_p0 = scmp.ne.s32.totalorder %s1080_s14, %s1076_s13 }
   0x8   : > { %p65_p1 = scmp.eq.s32.totalorder %s64_s20, 0  ;;  %p75_p2 = scmp.eq.s32.totalorder %s1084_s15, 0 }
   0x9   : > { %p80_p3 = scmp.ne.s32.totalorder %s1076_s13, %s1072_s12  ;;  %p1418_p4 = scmp.eq.s32.totalorder %s1135_s16, 0 }
   0xa   : > { %s1151_s21 = scalar_select %p65_p1, %s1080_s14, %s67_s19  }
   0xb   : > { %p1153_p5 = por %p75_p2, %p74_p0  ;;  %p1159_p6 = por %p1418_p4, %p80_p3 }
   0xc   : > { %p104_p7 = scmp.eq.s32.totalorder %s1135_s16, 1  ;;  %p110_p8 = scmp.eq.s32.totalorder %s691_s17, 1 }
   0xd   : > { %s1423_s22 = scalar_select %p1153_p5, 1, 0 }
   0xe   : > { %s1424_s23 = scalar_select %p1159_p6, 1, 0 }
   0xf   : > { %p692_p9 = scmp.ge.s32.totalorder %s1084_s15, 1  ;;  %p117_p10 = scmp.lt.s32.totalorder %s1084_s15, 3 }
  0x10   : > { %p1166_p11 = por %p104_p7, %p74_p0  ;;  %p1170_p12 = por %p110_p8, %p80_p3 }
  0x11   : > { %p1174_p13 = pnand %p692_p9, %p117_p10  ;;  %s1086_s27 = smov [#allocation2]  }
  0x12   : > { %s1425_s24 = scalar_select %p1166_p11, 1, 0 }
  0x13   : > { %s1426_s25 = scalar_select %p1170_p12, 1, 0 }
  0x14   : > { %s1427_s26 = scalar_select %p1174_p13, 1, 0 }
  0x15   : > { %p865_p1 = pneg %p1174_p13  ;;  %s129_s28 = sshll.u32 %s1086_s27, 4  ;;  %s130_s28 = int_to_ptr.vmem [resolvable:$true] %s129_s28 }
  0x16   : > { %s1087_s30 = smov [#allocation5]   ;;  %s924_s7 = scalar_lea.hbm %s1414_s0, 256 }
  0x17   : > { %p1182_p2 = pnand %p865_p1, %p1418_p4  ;;  %s142_s4 = sshll.u32 %s1087_s30, 4  ;;  %s143_s4 = int_to_ptr.vmem [resolvable:$true] %s142_s4 }
  0x18   : > { %p925_p7 = scmp.ne.s32.totalorder %s1414_s0, %s924_s7  ;;  %p931_p1 = scmp.lt.u32.totalorder %s924_s7, %s1414_s0 }
  0x19   : > { %p926_p8 = pneg %p1182_p2 }
  0x1b   : > { %p927_p9 = pnand %p926_p8, %p925_p7 }
  0x1d   : > { %p928_p10 = pneg %p927_p9 }
  0x1f   : > { %p933_p0 = pnand %p931_p1, %p928_p10 }
  0x21   : > { %936 = shalt.err (!%p933_p0)
}
  0x22   : > { %s937_s17 = scalar_lea.vmem %s130_s28, 256  ;;  %p945_p11 = scmp.lt.s32.totalorder %s130_s28, %s130_s28 }
  0x23   : > { %p938_p4 = scmp.ne.s32.totalorder %s130_s28, %s937_s17  ;;  %p946_p6 = scmp.lt.s32.totalorder %s937_s17, %s937_s17 }
  0x25   : > { %p940_p3 = pnand %p938_p4, %p926_p8  ;;  %p947_p13 = por %p946_p6, %p945_p11 }
  0x27   : > { %p941_p12 = pneg %p940_p3 }
  0x29   : > { %p948_p5 = pnand %p947_p13, %p941_p12 }
  0x2b   : > { %951 = shalt.err (!%p948_p5)
}
  0x2c   : > { %s1088_s19 = smov 128   ;;  %s1089_s20 = smov 8  }
  0x2d   : > { %868 = dma.hbm_to_vmem [thread:$0]  (!%p1182_p2), %s1414_s0, 256, %s130_s28, [#allocation3], %s1088_s19, %s1088_s19, %s1089_s20  }
  0x2e   : > { %p1429_p4 = scmp.ne.s32.totalorder %s1423_s22, 0  ;;  %p1430_p0 = scmp.lt.s32.totalorder %s1084_s15, 2 }
  0x2f   : > { %s952_s8 = scalar_lea.hbm %s1415_s1, 2048 }
  0x30   : > { %p1217_p3 = pnand %p1430_p0, %p1429_p4  ;;  %p953_p5 = scmp.ne.s32.totalorder %s1415_s1, %s952_s8 }
  0x31   : > { %p959_p12 = scmp.lt.u32.totalorder %s952_s8, %s1415_s1 }
  0x32   : > { %s1431_s5 = scalar_select %p1217_p3, 1, 0 }
  0x33   : > { %p955_p6 = pnand %p953_p5, %p926_p8 }
  0x35   : > { %p956_p11 = pneg %p955_p6 }
  0x37   : > { %p961_p13 = pnand %p959_p12, %p956_p11 }
  0x39   : > { %964 = shalt.err (!%p961_p13)
}
  0x3a   : > { %s965_s11 = scalar_lea.vmem %s143_s4, 2048  ;;  %p973_p1 = scmp.lt.s32.totalorder %s143_s4, %s143_s4 }
  0x3b   : > { %p966_p7 = scmp.ne.s32.totalorder %s143_s4, %s965_s11  ;;  %p974_p4 = scmp.lt.s32.totalorder %s965_s11, %s965_s11 }
  0x3d   : > { %p968_p9 = pnand %p966_p7, %p926_p8  ;;  %p975_p0 = por %p974_p4, %p973_p1 }
  0x3f   : > { %p969_p10 = pneg %p968_p9 }
  0x41   : > { %p976_p3 = pnand %p975_p0, %p969_p10 }
  0x43   : > { %979 = shalt.err (!%p976_p3)
}
  0x44   : > { %871 = dma.hbm_to_vmem [thread:$0]  (!%p1182_p2), %s1415_s1, 2048, %s143_s4, [#allocation6], %s1088_s19, %s1088_s19, %s1089_s20  }
  0x45   : > { %s156_s30 = sand.u32 1, %s1084_s15   ;;  %s158_s6 = sand.u32 1, %s1080_s14  }
  0x46   : > { %s696_s7 = sshll.u32 %s158_s6, 6  ;;  %s733_s8 = sshll.u32 %s1084_s15, 10 }
  0x47   : > { %s1250_s29 = scalar_lea.hbm %s1416_s2, %s733_s8  ;;  %s160_s28 = scalar_lea.vmem [#allocation7], %s696_s7 }
  0x48   : > { %s167_s22 = sshll.u32 %s160_s28, 4  ;;  %s1254_s11 = scalar_lea.sflag [#allocation3], %s156_s30  ;;  %s1252_s22 = int_to_ptr.vmem [resolvable:$true] %s167_s22 }
  0x49   : > { %s980_s4 = scalar_lea.hbm %s1250_s29, 1024  ;;  %p1432_p8 = scmp.ne.s32.totalorder %s1431_s5, 0 }
  0x4a   : > { %p981_p2 = scmp.ne.s32.totalorder %s1250_s29, %s980_s4  ;;  %s985_s6 = scalar_lea.hbm %s1416_s2, 2048 }
  0x4b   : > { %p982_p3 = pneg %p1432_p8  ;;  %p986_p11 = scmp.lt.u32.totalorder %s1250_s29, %s1416_s2 }
  0x4c   : > { %p987_p12 = scmp.lt.u32.totalorder %s985_s6, %s980_s4  ;;  %p989_p7 = scmp.lt.u32.totalorder %s980_s4, %s1250_s29 }
  0x4d   : > { %p983_p5 = pnand %p982_p3, %p981_p2 }
  0x4e   : > { %p988_p13 = por %p987_p12, %p986_p11 }
  0x4f   : > { %p984_p6 = pneg %p983_p5 }
  0x50   : > { %p990_p9 = por %p989_p7, %p988_p13 }
  0x52   : > { %p991_p10 = pnand %p990_p9, %p984_p6 }
  0x54   : > { %994 = shalt.err (!%p991_p10)
}
  0x55   : > { %s995_s30 = scalar_lea.vmem %s1252_s22, 1024  ;;  %s1090_s7 = smov [#allocation7]  }
  0x56   : > { %p996_p1 = scmp.ne.s32.totalorder %s1252_s22, %s995_s30  ;;  %s1000_s10 = sshll.u32 %s1090_s7, 4  ;;  %s1001_s10 = int_to_ptr.vmem [resolvable:$false] %s1000_s10 }
  0x57   : > { %s1002_s28 = scalar_lea.vmem %s1001_s10, 2048  ;;  %p1003_p2 = scmp.lt.s32.totalorder %s1252_s22, %s1001_s10 }
  0x58   : > { %p998_p4 = pnand %p996_p1, %p982_p3  ;;  %p1004_p5 = scmp.lt.s32.totalorder %s1002_s28, %s995_s30 }
  0x5a   : > { %p999_p0 = pneg %p998_p4  ;;  %p1005_p11 = por %p1004_p5, %p1003_p2 }
  0x5c   : > { %p1006_p12 = pnand %p1005_p11, %p999_p0 }
  0x5e   : > { %1009 = shalt.err (!%p1006_p12)
}
  0x5f   : > { %875 = dma.hbm_to_vmem [thread:$0]  (!%p1432_p8), %s1250_s29, 1024, %s1252_s22, %s1254_s11, %s1088_s19, %s1088_s19, %s1089_s20  }
  0x60   : > { %p1433_p3 = scmp.ne.s32.totalorder %s1427_s26, 0 }
  0x61   : > { %p1434_p6 = scmp.eq.s32.totalorder (!%p1433_p3), %s1135_s16, 0 }
  0x62   : > { %179 = sbr.rel (%p1433_p3) target bundleno = 596 (0x254), region = 32 }
  0x69   : > { %1055 = dma.done.wait (%p1434_p6), [#allocation3], 256   ;;  %p1435_p13 = pmov %p1434_p6 }
  0x6a   : > { %p1436_p7 = pmov %p1434_p6 }
  0x6b   : > { %1057 = vsyncadd (%p1435_p13), [#allocation3], 4294967040 }
  0x6c   : > { %1059 = dma.done.wait (%p1436_p7), [#allocation6], 2048   ;;  %p1437_p9 = pmov %p1434_p6 }
  0x6d   : > { %s189_s5 = sand.u32 1, %s1135_s16   ;;  %s1297_s19 = sand.u32 1, %s1076_s13  }
  0x6e   : > { %1061 = vsyncadd (%p1437_p9), [#allocation6], 4294965248  ;;  %s702_s26 = sshll.u32 %s1297_s19, 6  ;;  %s190_s20 = scalar_lea.sflag [#allocation3], %s189_s5 }
  0x6f   : > { %s193_s29 = scalar_lea.vmem [#allocation7], %s702_s26  ;;  %p1438_p8 = scmp.ne.s32.totalorder %s1424_s23, 0 }
  0x71   : > { %1063 = dma.done.wait (%p1438_p8), %s190_s20, 1024  }
  0x72   : > { %1065 = vsyncadd (%p1438_p8), %s190_s20, 4294966272  ;;  %vm228_vm0 = vcmask 130048   ;;  %v226_v0 = vld [vmem:[#allocation2] sm:$0xff]  ;;  %v227_v1 = vld [vmem:[#allocation2 + $0x8] sm:$0xff]  ;;  %vm374_vm1 = vcmask 523264   ;;  %s703_s23 = sshll.u32 %s1297_s19, 7 }
  0x73   : > { %v218_v2 = vld [vmem:[%s193_s29] sm:$0xff]  ;;  %v825_v3 = vpack.c.bf16 %v227_v1, %v226_v0  ;;  %v219_v4 = vld [vmem:[%s193_s29 + $0x8] sm:$0xff]  ;;  %v220_v5 = vld [vmem:[%s193_s29 + $0x10] sm:$0xff]  ;;  %vm568_vm2 = vcmask 261120   ;;  %s1329_s22 = scalar_lea.vmem [#allocation8], %s703_s23  ;;  %s734_s11 = sshll.u32 %s1135_s16, 11 }
  0x74   : > { %773 = vmatprep.mubr.msk.f32.mxu0 %vm228_vm0, %v218_v2  ;;  %v221_v6 = vld [vmem:[%s193_s29 + $0x18] sm:$0xff]  ;;  %v222_v7 = vld [vmem:[%s193_s29 + $0x20] sm:$0xff]  ;;  %v223_v8 = vld [vmem:[%s193_s29 + $0x28] sm:$0xff]  ;;  %s599_s4 = sshll.u32 %s1329_s22, 4  ;;  %s1364_s6 = scalar_lea.hbm %s1417_s3, %s734_s11  ;;  %s1366_s4 = int_to_ptr.vmem [resolvable:$true] %s599_s4 }
  0x75   : > { %826 = vmatprep.subr.bf16.mxu0 %v825_v3  ;;  %v224_v9 = vld [vmem:[%s193_s29 + $0x30] sm:$0xff]  ;;  %v225_v10 = vld [vmem:[%s193_s29 + $0x38] sm:$0xff]  ;;  %v358_v12 = vld [vmem:[#allocation5] sm:$0xff]  ;;  %s586_s16 = scalar_lea.sflag [#allocation4], %s1297_s19  ;;  %s1010_s8 = scalar_lea.vmem %s1366_s4, 2048 }
  0x76   : > { %828 = vmatpush3.bf16.msra.mxu0 %v825_v3  ;;  %v364_v11 = vld [vmem:[#allocation5 + $0x30] sm:$0xff]  ;;  %v365_v25 = vld [vmem:[#allocation5 + $0x38] sm:$0xff]  ;;  %v359_v26 = vld [vmem:[#allocation5 + $0x8] sm:$0xff]  ;;  %p1011_p10 = scmp.ne.s32.totalorder %s1366_s4, %s1010_s8  ;;  %p1439_p1 = scmp.ne.s32.totalorder %s1425_s24, 0 }
  0x77   : > { %810 = vmatprep.mubr.msk.f32.mxu1 %vm374_vm1, %v364_v11  ;;  %v366_v27 = vld [vmem:[#allocation5 + $0x40] sm:$0xff]  ;;  %v360_v28 = vld [vmem:[#allocation5 + $0x10] sm:$0xff]  ;;  %v367_v29 = vld [vmem:[#allocation5 + $0x48] sm:$0xff]  ;;  %s1091_s9 = smov [#allocation8]  }
  0x78   : > { %v361_v30 = vld [vmem:[#allocation5 + $0x18] sm:$0xff]  ;;  %v368_v31 = vld [vmem:[#allocation5 + $0x50] sm:$0xff]  ;;  %v362_v32 = vld [vmem:[#allocation5 + $0x20] sm:$0xff]  ;;  %p1012_p4 = pnand %p1011_p10, %p1439_p1  ;;  %s1014_s30 = sshll.u32 %s1091_s9, 4  ;;  %s1015_s30 = int_to_ptr.vmem [resolvable:$false] %s1014_s30 }
  0x79   : > { %774 = vmatmul.mubr.msk.f32.vlgmr.msra.gmra.mrb[0].mxu0 %vm228_vm0, %v219_v4  ;;  %v369_v33 = vld [vmem:[#allocation5 + $0x58] sm:$0xff]  ;;  %v363_v34 = vld [vmem:[#allocation5 + $0x28] sm:$0xff]  ;;  %v370_v35 = vld [vmem:[#allocation5 + $0x60] sm:$0xff]  ;;  %s1016_s7 = scalar_lea.vmem %s1015_s30, 4096  ;;  %p1017_p2 = scmp.lt.s32.totalorder %s1366_s4, %s1015_s30 }
  0x7a   : > { %776 = vmatprep.mubr.msk.f32.mxu0 %vm228_vm0, %v220_v5  ;;  %v371_v36 = vld [vmem:[#allocation5 + $0x68] sm:$0xff]  ;;  %v372_v37 = vld [vmem:[#allocation5 + $0x70] sm:$0xff]  ;;  %v373_v38 = vld [vmem:[#allocation5 + $0x78] sm:$0xff]  ;;  %p1013_p0 = pneg %p1012_p4  ;;  %p1018_p5 = scmp.lt.s32.totalorder %s1016_s7, %s1010_s8 }
  0x7c   : > { %p1019_p11 = por %p1018_p5, %p1017_p2 }
  0x7d   : > { %777 = vmatmul.mubr.msk.f32.gmra.mrb[2].mxu0 %vm228_vm0, %v221_v6 }
  0x7e   : > { %779 = vmatprep.mubr.msk.f32.mxu0 %vm228_vm0, %v222_v7  ;;  %p1020_p12 = pnand %p1019_p11, %p1013_p0 }
  0x81   : > { %780 = vmatmul.mubr.msk.f32.gmra.mrb[4].mxu0 %vm228_vm0, %v223_v8 }
  0x82   : > { %782 = vmatprep.mubr.msk.f32.mxu0 %vm228_vm0, %v224_v9 }
  0x85   : > { %783 = vmatmul.mubr.msk.f32.gmra.mrb[6].mxu0 %vm228_vm0, %v225_v10 }
  0x86   : > { %801 = vmatprep.mubr.msk.f32.mxu0 %vm374_vm1, %v358_v12 }
 0x14c   : > { %v775_v13 = vpop.f32.mrb[0].mxu0 }
 0x14d   : > { %v319_v14 = vpop.f32.mrb[1].mxu0 }
 0x14e   : > { %v829_v15 = vpack.c.bf16 %v775_v13, %v319_v14 }
 0x150   : > { %v778_v16 = vpop.f32.mrb[2].mxu0  ;;  %830 = vmatprep.subr.bf16.mxu0 %v829_v15  ;;  %845 = vmatprep.subr.bf16.mxu1 %v829_v15 }
 0x151   : > { %v329_v17 = vpop.f32.mrb[3].mxu0  ;;  %832 = vmatpush3.bf16.msra.mxu0 %v829_v15  ;;  %849 = vmatpush3.bf16.msra.mxu1 %v829_v15 }
 0x152   : > { %v833_v18 = vpack.c.bf16 %v778_v16, %v329_v17 }
 0x154   : > { %v781_v19 = vpop.f32.mrb[4].mxu0  ;;  %834 = vmatprep.subr.bf16.mxu0 %v833_v18  ;;  %846 = vmatprep.subr.bf16.mxu1 %v833_v18 }
 0x155   : > { %v339_v20 = vpop.f32.mrb[5].mxu0  ;;  %836 = vmatpush3.bf16.msra.mxu0 %v833_v18  ;;  %850 = vmatpush3.bf16.msra.mxu1 %v833_v18 }
 0x156   : > { %v837_v21 = vpack.c.bf16 %v781_v19, %v339_v20 }
 0x158   : > { %v784_v22 = vpop.f32.mrb[6].mxu0  ;;  %838 = vmatprep.subr.bf16.mxu0 %v837_v21  ;;  %847 = vmatprep.subr.bf16.mxu1 %v837_v21 }
 0x159   : > { %v349_v23 = vpop.f32.mrb[7].mxu0  ;;  %840 = vmatpush3.bf16.msra.mxu0 %v837_v21  ;;  %851 = vmatpush3.bf16.msra.mxu1 %v837_v21 }
 0x15a   : > { %v841_v24 = vpack.c.bf16 %v784_v22, %v349_v23 }
 0x15c   : > { %842 = vmatprep.subr.bf16.mxu0 %v841_v24  ;;  %848 = vmatprep.subr.bf16.mxu1 %v841_v24 }
 0x15d   : > { %844 = vmatpush3.bf16.msra.mxu0 %v841_v24  ;;  %852 = vmatpush3.bf16.msra.mxu1 %v841_v24 }
 0x160   : > { %811 = vmatmul.mubr.msk.f32.vlgmr.msra.gmra.mrb[0].mxu1 %vm374_vm1, %v365_v25  ;;  %802 = vmatmul.mubr.msk.f32.vlgmr.msra.gmra.mrb[8].mxu0 %vm374_vm1, %v359_v26 }
 0x161   : > { %813 = vmatprep.mubr.msk.f32.mxu1 %vm374_vm1, %v366_v27  ;;  %804 = vmatprep.mubr.msk.f32.mxu0 %vm374_vm1, %v360_v28 }
 0x164   : > { %814 = vmatmul.mubr.msk.f32.gmra.mrb[2].mxu1 %vm374_vm1, %v367_v29  ;;  %805 = vmatmul.mubr.msk.f32.gmra.mrb[10].mxu0 %vm374_vm1, %v361_v30 }
 0x165   : > { %816 = vmatprep.mubr.msk.f32.mxu1 %vm374_vm1, %v368_v31  ;;  %807 = vmatprep.mubr.msk.f32.mxu0 %vm374_vm1, %v362_v32 }
 0x168   : > { %817 = vmatmul.mubr.msk.f32.gmra.mrb[4].mxu1 %vm374_vm1, %v369_v33  ;;  %808 = vmatmul.mubr.msk.f32.gmra.mrb[12].mxu0 %vm374_vm1, %v363_v34 }
 0x169   : > { %819 = vmatprep.mubr.msk.f32.mxu1 %vm374_vm1, %v370_v35 }
 0x16c   : > { %820 = vmatmul.mubr.msk.f32.gmra.mrb[6].mxu1 %vm374_vm1, %v371_v36 }
 0x16d   : > { %822 = vmatprep.mubr.msk.f32.mxu1 %vm374_vm1, %v372_v37 }
 0x170   : > { %823 = vmatmul.mubr.msk.f32.gmra.mrb[8].mxu1 %vm374_vm1, %v373_v38 }
 0x233   : > { %v812_v39 = vpop.f32.mrb[0].mxu1  ;;  %v803_v40 = vpop.f32.mrb[8].mxu0 }
 0x234   : > { %576 = vst.msk [vmem:[%s1329_s22 + $0x38] sm:$0xff] %vm568_vm2, %v812_v39  ;;  %v519_v41 = vpop.f32.mrb[1].mxu1  ;;  %570 = vst.msk [vmem:[%s1329_s22 + $0x8] sm:$0xff] %vm568_vm2, %v803_v40  ;;  %v489_v42 = vpop.f32.mrb[9].mxu0 }
 0x235   : > { %575 = vst.msk [vmem:[%s1329_s22 + $0x30] sm:$0xff] %vm568_vm2, %v519_v41  ;;  %569 = vst.msk [vmem:[%s1329_s22] sm:$0xff] %vm568_vm2, %v489_v42 }
 0x237   : > { %v815_v43 = vpop.f32.mrb[2].mxu1  ;;  %v806_v44 = vpop.f32.mrb[10].mxu0 }
 0x238   : > { %578 = vst.msk [vmem:[%s1329_s22 + $0x48] sm:$0xff] %vm568_vm2, %v815_v43  ;;  %v529_v45 = vpop.f32.mrb[3].mxu1  ;;  %572 = vst.msk [vmem:[%s1329_s22 + $0x18] sm:$0xff] %vm568_vm2, %v806_v44  ;;  %v499_v46 = vpop.f32.mrb[11].mxu0 }
 0x239   : > { %577 = vst.msk [vmem:[%s1329_s22 + $0x40] sm:$0xff] %vm568_vm2, %v529_v45  ;;  %571 = vst.msk [vmem:[%s1329_s22 + $0x10] sm:$0xff] %vm568_vm2, %v499_v46 }
 0x23b   : > { %v818_v47 = vpop.f32.mrb[4].mxu1  ;;  %v809_v48 = vpop.f32.mrb[12].mxu0 }
 0x23c   : > { %580 = vst.msk [vmem:[%s1329_s22 + $0x58] sm:$0xff] %vm568_vm2, %v818_v47  ;;  %v539_v49 = vpop.f32.mrb[5].mxu1  ;;  %574 = vst.msk [vmem:[%s1329_s22 + $0x28] sm:$0xff] %vm568_vm2, %v809_v48  ;;  %v509_v50 = vpop.f32.mrb[13].mxu0 }
 0x23d   : > { %579 = vst.msk [vmem:[%s1329_s22 + $0x50] sm:$0xff] %vm568_vm2, %v539_v49  ;;  %573 = vst.msk [vmem:[%s1329_s22 + $0x20] sm:$0xff] %vm568_vm2, %v509_v50 }
 0x23f   : > { %v821_v51 = vpop.f32.mrb[6].mxu1 }
 0x240   : > { %582 = vst.msk [vmem:[%s1329_s22 + $0x68] sm:$0xff] %vm568_vm2, %v821_v51  ;;  %v549_v52 = vpop.f32.mrb[7].mxu1 }
 0x241   : > { %581 = vst.msk [vmem:[%s1329_s22 + $0x60] sm:$0xff] %vm568_vm2, %v549_v52 }
 0x243   : > { %v824_v53 = vpop.f32.mrb[8].mxu1 }
 0x244   : > { %584 = vst.msk [vmem:[%s1329_s22 + $0x78] sm:$0xff] %vm568_vm2, %v824_v53  ;;  %v559_v54 = vpop.f32.mrb[9].mxu1 }
 0x245   : > { %583 = vst.msk [vmem:[%s1329_s22 + $0x70] sm:$0xff] %vm568_vm2, %v559_v54 }
 0x246   : > { %1023 = shalt.err (!%p1020_p12)
}
 0x247   : > { %s1024_s10 = scalar_lea.hbm %s1364_s6, 2048  ;;  %s1028_s26 = scalar_lea.hbm %s1417_s3, 4096 }
 0x248   : > { %p1025_p3 = scmp.ne.s32.totalorder %s1364_s6, %s1024_s10  ;;  %p1029_p7 = scmp.lt.u32.totalorder %s1364_s6, %s1417_s3 }
 0x249   : > { %p1030_p9 = scmp.lt.u32.totalorder %s1028_s26, %s1024_s10  ;;  %p1032_p10 = scmp.lt.u32.totalorder %s1024_s10, %s1364_s6 }
 0x24a   : > { %p1026_p6 = pnand %p1025_p3, %p1439_p1 }
 0x24b   : > { %p1031_p8 = por %p1030_p9, %p1029_p7 }
 0x24c   : > { %p1027_p13 = pneg %p1026_p6 }
 0x24d   : > { %p1033_p4 = por %p1032_p10, %p1031_p8 }
 0x24f   : > { %p1034_p0 = pnand %p1033_p4, %p1027_p13 }
 0x251   : > { %1037 = shalt.err (!%p1034_p0)
}
 0x252   : > { %s1092_s23 = smov 128   ;;  %s1093_s22 = smov 8  }
 0x253   : > { %863 = dma.vmem_to_hbm [thread:$0]  (%p1439_p1), %s1366_s4, 2048, %s1364_s6, %s586_s16, %s1092_s23, %s1092_s23, %s1093_s22  }
 0x254 PF: > { %s614_s11 = sand.u32 1, %s1072_s12   ;;  %p1440_p2 = scmp.ne.s32.totalorder %s1426_s25, 0 }
 0x255   : > { %p1441_p5 = scmp.ge.s32.totalorder %s1084_s15, 2  ;;  %s615_s17 = scalar_lea.sflag [#allocation4], %s614_s11 }
 0x257   : > { %p877_p11 = pnand %p1441_p5, %p1440_p2 }
 0x259   : > { %1067 = dma.done.wait (!%p877_p11), %s615_s17, 2048  }
 0x25a   : > { %1069 = vsyncadd (!%p877_p11), %s615_s17, 4294965248  ;;  %p15_p12 = scmp.ge.s32.totalorder %s1139_s18, 4   ;;  %s1442_s12 = smov %s1076_s13 }
 0x25b   : > { %s1443_s13 = smov %s1080_s14  ;;  %s1444_s14 = smov %s1151_s21 }
 0x25c   : > { %s1445_s15 = smov %s1139_s18  ;;  %17 = sbr.rel (!%p15_p12) target bundleno = 5 (0x5), region = 84 }
 0x263   :  { %620 = vsyncpa [#allocation3], 1 }
 0x264   :  { %622 = vsyncpa [#allocation3 + $0x1], 1 }
 0x265   :  { %623 = vsyncpa [#allocation6], 1 }
 0x266   :  { %624 = vsyncpa [#allocation4], 1 }
 0x267   :  { %626 = vsyncpa [#allocation4 + $0x1], 1 }

</bundles_post_ra>
